<compile_context>
chip_gen: v5e
topology: v5e:2x2
jax: 0.10.0
libtpu: 0.0.40
codegen_flags: <defaults>
</compile_context>

<pallas_src>
import functools

import jax
import jax.numpy as jnp
from jax import lax
from jax.experimental import pallas as pl
from jax.experimental.pallas import tpu as pltpu


def _mha_kernel(x_ref, wq_ref, wk_ref, wv_ref, wo_ref, g_ref, b_ref,
                o_ref, k_scr, v_scr, *, n_heads, q_tile):
    # x_ref : (1, N, D) full sequence of this batch element (resident across
    #         all query-tile steps of the same b).
    # o_ref : (1, TQ, D) output rows for this grid step.
    # k_scr / v_scr : (N, D) f32 VMEM — per-batch-element K/V cache.
    i = pl.program_id(1)
    N, D = x_ref.shape[1], x_ref.shape[2]
    dh = D // n_heads
    inv_sqrt_d = 1.0 / (dh ** 0.5)

    # --- K/V projections: once per batch element (review item 1) -----------
    @pl.when(i == 0)
    def _():
        x_seq = x_ref[0]                                            # (N, D)
        k_scr[...] = jnp.dot(x_seq, wk_ref[...],
                             preferred_element_type=jnp.float32)    # (N, D)
        v_scr[...] = jnp.dot(x_seq, wv_ref[...],
                             preferred_element_type=jnp.float32)    # (N, D)

    # --- Query rows for this step, sliced from the resident block ----------
    row0 = pl.multiple_of(i * q_tile, q_tile)
    xq = x_ref[0, pl.ds(row0, q_tile), :]                           # (TQ, D)
    q = jnp.dot(xq, wq_ref[...], preferred_element_type=jnp.float32)  # (TQ, D)
    k = k_scr[...]                                                  # (N, D)
    v = v_scr[...]                                                  # (N, D)

    # --- Per-head attention (static unroll; head slices are static) --------
    # Reference semantics: softmax WITHOUT pre-scaling, then the probabilities
    # are divided by sqrt(head_dim).  Both the softmax denominator and the
    # sqrt scale are deferred onto the (TQ, dh) head output by linearity.
    # TODO(synk): replace the unrolled loop with one head-batched dot_general
    # once the (TQ, D)->(H, TQ, dh) relayout is worthwhile (head_dim >= 128).
    heads = []
    for h in range(n_heads):
        lo, hi = h * dh, (h + 1) * dh
        qh = q[:, lo:hi]                                            # (TQ, dh)
        kh = k[:, lo:hi]                                            # (N,  dh)
        vh = v[:, lo:hi]                                            # (N,  dh)

        # q @ k^T with the transpose folded into the contraction dims.
        s = lax.dot_general(qh, kh, (((1,), (1,)), ((), ())),
                            preferred_element_type=jnp.float32)     # (TQ, N)
        s = s - jnp.max(s, axis=-1, keepdims=True)
        p = jnp.exp(s)                                              # (TQ, N)
        oh = jnp.dot(p, vh, preferred_element_type=jnp.float32)     # (TQ, dh)
        # Exact reciprocal to stay bit-close to the f32 reference; flip to
        # approx=True to push the divide onto the EUP slot.
        row_scale = inv_sqrt_d * pl.reciprocal(
            jnp.sum(p, axis=-1, keepdims=True), approx=False)       # (TQ, 1)
        heads.append(oh * row_scale)

    # Lane-dense, register-resident context (no VMEM ctx scratch round-trip).
    ctx = jnp.concatenate(heads, axis=-1)                           # (TQ, D)

    # --- LayerNorm (torch defaults: eps=1e-5, affine) + output projection --
    mu = jnp.mean(ctx, axis=-1, keepdims=True)
    var = jnp.mean((ctx - mu) ** 2, axis=-1, keepdims=True)
    xn = (ctx - mu) * lax.rsqrt(var + 1e-5)
    xn = xn * g_ref[0] + b_ref[0]

    out = jnp.dot(xn, wo_ref[...], preferred_element_type=jnp.float32)
    o_ref[0] = out.astype(o_ref.dtype)


def _pick_q_tile(n, q_block):
    """Largest multiple-of-8 divisor of n that is <= q_block (else n)."""
    if n <= q_block or n % 8 != 0:
        return n
    for t in range(min(q_block, n), 7, -8):
        if n % t == 0:
            return t
    return n


def multi_head_attention(x, wq, wk, wv, wo, gamma, beta, *, n_heads,
                         q_block=None):
    """Pallas MHA forward. x: (B, N, D) or (N, D). Returns (B, N, D)."""
    # TODO(synk): optional additive `mask` argument of the reference module is
    # not wired through (the forward default mask=None path is implemented).
    if x.ndim == 2:
        x = x[None]
    B, N, D = x.shape
    assert D % n_heads == 0

    # One-time layout plumbing outside the kernel:
    # PyTorch Linear weight (out, in) -> (in, out).
    wq_t, wk_t, wv_t, wo_t = wq.T, wk.T, wv.T, wo.T
    gamma2 = gamma.reshape(1, D)
    beta2 = beta.reshape(1, D)

    # Generation-aware VMEM budget / query tile (review items 5, 7).
    try:
        vmem_cap = int(pltpu.get_tpu_info().vmem_capacity_bytes)
    except Exception:
        vmem_cap = 128 * 1024 * 1024
    vmem_limit = (vmem_cap * 3) // 4
    if q_block is None:
        q_block = 256 if vmem_cap <= 64 * 1024 * 1024 else 512

    tq = _pick_q_tile(N, q_block)
    n_q = N // tq
    # TODO(synk): for very large N on v7x (64 MiB VMEM) the K/V cache should
    # also be tiled with an online (flash-style) softmax instead of held whole.

    kernel = functools.partial(_mha_kernel, n_heads=n_heads, q_tile=tq)
    return pl.pallas_call(
        kernel,
        out_shape=jax.ShapeDtypeStruct((B, N, D), x.dtype),
        grid=(B, n_q),
        in_specs=[
            # Full sequence of this batch element; constant across the q-tile
            # axis, so it is fetched once per batch element.
            pl.BlockSpec((1, N, D), lambda b, i: (b, 0, 0)),
            # Grid-invariant weights (never re-fetched; double-buffered by
            # default — pl.Buffered(1) single-buffering deliberately not wired).
            pl.BlockSpec((D, D), lambda b, i: (0, 0)),          # wq^T
            pl.BlockSpec((D, D), lambda b, i: (0, 0)),          # wk^T
            pl.BlockSpec((D, D), lambda b, i: (0, 0)),          # wv^T
            pl.BlockSpec((D, D), lambda b, i: (0, 0)),          # out_proj^T
            pl.BlockSpec((1, D), lambda b, i: (0, 0)),          # layernorm gamma
            pl.BlockSpec((1, D), lambda b, i: (0, 0)),          # layernorm beta
        ],
        out_specs=pl.BlockSpec((1, tq, D), lambda b, i: (b, i, 0)),
        scratch_shapes=[
            pltpu.VMEM((N, D), jnp.float32),   # K cache (per batch element)
            pltpu.VMEM((N, D), jnp.float32),   # V cache (per batch element)
        ],
        compiler_params=pltpu.CompilerParams(
            # Batch axis megacore-parallel; q-tile axis serial so the K/V
            # scratch carry (written at i == 0) is well-defined.
            dimension_semantics=("parallel", "arbitrary"),
            vmem_limit_bytes=vmem_limit),
    )(x, wq_t, wk_t, wv_t, wo_t, gamma2, beta2)


def _xavier_uniform(key, shape):
    fan_out, fan_in = shape
    limit = (6.0 / (fan_in + fan_out)) ** 0.5
    return jax.random.uniform(key, shape, jnp.float32, -limit, limit)


def _reference(x, wq, wk, wv, wo, gamma, beta, n_heads):
    """Pure-JAX reference mirroring the PyTorch forward exactly."""
    B, N, D = x.shape
    dh = D // n_heads
    q = (x @ wq.T).reshape(B, N, n_heads, dh).transpose(0, 2, 1, 3)
    k = (x @ wk.T).reshape(B, N, n_heads, dh).transpose(0, 2, 1, 3)
    v = (x @ wv.T).reshape(B, N, n_heads, dh).transpose(0, 2, 1, 3)
    sim = jnp.einsum('bhnd,bhsd->bhns', q, k)
    attn = jax.nn.softmax(sim, axis=-1) / (dh ** 0.5)
    o = jnp.einsum('bhns,bhsd->bhnd', attn, v)
    o = o.transpose(0, 2, 1, 3).reshape(B, N, D)
    mu = o.mean(-1, keepdims=True)
    var = ((o - mu) ** 2).mean(-1, keepdims=True)
    xn = (o - mu) / jnp.sqrt(var + 1e-5) * gamma + beta
    return xn @ wo.T


if __name__ == "__main__":
    B, N, dim, n_heads = 2, 8, 32, 4

    key = jax.random.PRNGKey(0)
    kx, kq, kk, kv, ko = jax.random.split(key, 5)

    x = jax.random.normal(kx, (B, N, dim), jnp.float32)
    wq = _xavier_uniform(kq, (dim, dim))
    wk = _xavier_uniform(kk, (dim, dim))
    wv = _xavier_uniform(kv, (dim, dim))
    wo = _xavier_uniform(ko, (dim, dim))
    gamma = jnp.ones((dim,), jnp.float32)   # nn.LayerNorm defaults
    beta = jnp.zeros((dim,), jnp.float32)

    out = multi_head_attention(x, wq, wk, wv, wo, gamma, beta, n_heads=n_heads)
    out = jax.block_until_ready(out)

    ref = _reference(x, wq, wk, wv, wo, gamma, beta, n_heads)
    assert out.shape == (B, N, dim)
    assert jnp.allclose(out, ref, atol=1e-4, rtol=1e-4), "mismatch vs reference"

    print("KERNEL_OK")
</pallas_src>

<mosaic_0001>
module attributes {stable_mosaic.version = 11 : i64} {
  func.func @_mha_kernel(%arg0: i32, %arg1: i32, %arg2: memref<1x8x32xf32, #tpu.memory_space<vmem>>, %arg3: memref<32x32xf32, #tpu.memory_space<vmem>>, %arg4: memref<32x32xf32, #tpu.memory_space<vmem>>, %arg5: memref<32x32xf32, #tpu.memory_space<vmem>>, %arg6: memref<32x32xf32, #tpu.memory_space<vmem>>, %arg7: memref<1x32xf32, #tpu.memory_space<vmem>>, %arg8: memref<1x32xf32, #tpu.memory_space<vmem>>, %arg9: memref<1x8x32xf32, #tpu.memory_space<vmem>>, %arg10: memref<8x32xf32, #tpu.memory_space<vmem>>, %arg11: memref<8x32xf32, #tpu.memory_space<vmem>>) attributes {dimension_semantics = [#tpu.dimension_semantics<parallel>, #tpu.dimension_semantics<arbitrary>], iteration_bounds = array<i64: 2, 1>, scalar_prefetch = 0 : i64, scratch_operands = 2 : i64, tpu.core_type = #tpu.core_type<tc>, window_params = [{transform_indices = @transform_0, window_bounds = array<i64: 1, 8, 32>}, {pipeline_mode = #tpu.pipeline_mode<synchronous>, transform_indices = @transform_1, window_bounds = array<i64: 32, 32>}, {pipeline_mode = #tpu.pipeline_mode<synchronous>, transform_indices = @transform_2, window_bounds = array<i64: 32, 32>}, {pipeline_mode = #tpu.pipeline_mode<synchronous>, transform_indices = @transform_3, window_bounds = array<i64: 32, 32>}, {pipeline_mode = #tpu.pipeline_mode<synchronous>, transform_indices = @transform_4, window_bounds = array<i64: 32, 32>}, {pipeline_mode = #tpu.pipeline_mode<synchronous>, transform_indices = @transform_5, window_bounds = array<i64: 1, 32>}, {pipeline_mode = #tpu.pipeline_mode<synchronous>, transform_indices = @transform_6, window_bounds = array<i64: 1, 32>}, {transform_indices = @transform_7, window_bounds = array<i64: 1, 8, 32>}]} {
    %c0_i32 = arith.constant 0 : i32
    %0 = arith.cmpi eq, %arg1, %c0_i32 : i32
    %1 = arith.extui %0 : i1 to i32
    %c0_i32_0 = arith.constant 0 : i32
    %2 = arith.cmpi ne, %1, %c0_i32_0 : i32
    scf.if %2 {
      %c0_43 = arith.constant 0 : index
      %c0_44 = arith.constant 0 : index
      %c0_45 = arith.constant 0 : index
      %114 = vector.load %arg2[%c0_43, %c0_44, %c0_45] : memref<1x8x32xf32, #tpu.memory_space<vmem>>, vector<1x8x32xf32>
      %115 = vector.shape_cast %114 : vector<1x8x32xf32> to vector<8x32xf32>
      %c0_46 = arith.constant 0 : index
      %c0_47 = arith.constant 0 : index
      %116 = vector.load %arg4[%c0_46, %c0_47] : memref<32x32xf32, #tpu.memory_space<vmem>>, vector<32x32xf32>
      %cst_48 = arith.constant dense<0.000000e+00> : vector<8x32xf32>
      %117 = tpu.matmul %115, %116, %cst_48 {dimension_numbers = #tpu.dot_dimension_numbers<[1], [0], [0], [1], [0, 0, 1, 1], [], []>} : vector<8x32xf32>, vector<32x32xf32>, vector<8x32xf32> -> vector<8x32xf32>
      %c0_49 = arith.constant 0 : index
      %c0_50 = arith.constant 0 : index
      %118 = vector.load %arg10[%c0_49, %c0_50] : memref<8x32xf32, #tpu.memory_space<vmem>>, vector<8x32xf32>
      tpu.vector_store %arg10[%c0_49, %c0_50], %117 {strides = array<i32>} : memref<8x32xf32, #tpu.memory_space<vmem>>, vector<8x32xf32>,
      %c0_51 = arith.constant 0 : index
      %c0_52 = arith.constant 0 : index
      %119 = vector.load %arg5[%c0_51, %c0_52] : memref<32x32xf32, #tpu.memory_space<vmem>>, vector<32x32xf32>
      %cst_53 = arith.constant dense<0.000000e+00> : vector<8x32xf32>
      %120 = tpu.matmul %115, %119, %cst_53 {dimension_numbers = #tpu.dot_dimension_numbers<[1], [0], [0], [1], [0, 0, 1, 1], [], []>} : vector<8x32xf32>, vector<32x32xf32>, vector<8x32xf32> -> vector<8x32xf32>
      %c0_54 = arith.constant 0 : index
      %c0_55 = arith.constant 0 : index
      %121 = vector.load %arg11[%c0_54, %c0_55] : memref<8x32xf32, #tpu.memory_space<vmem>>, vector<8x32xf32>
      tpu.vector_store %arg11[%c0_54, %c0_55], %120 {strides = array<i32>} : memref<8x32xf32, #tpu.memory_space<vmem>>, vector<8x32xf32>,
    } else {
    }
    %c8_i32 = arith.constant 8 : i32
    %3 = arith.muli %arg1, %c8_i32 : i32
    %4 = tpu.assume_multiple %3, 8 : i32
    %c0 = arith.constant 0 : index
    %5 = arith.index_cast %4 : i32 to index
    %c0_1 = arith.constant 0 : index
    %6 = vector.load %arg2[%c0, %5, %c0_1] : memref<1x8x32xf32, #tpu.memory_space<vmem>>, vector<1x8x32xf32>
    %7 = vector.shape_cast %6 : vector<1x8x32xf32> to vector<8x32xf32>
    %c0_2 = arith.constant 0 : index
    %c0_3 = arith.constant 0 : index
    %8 = vector.load %arg3[%c0_2, %c0_3] : memref<32x32xf32, #tpu.memory_space<vmem>>, vector<32x32xf32>
    %cst = arith.constant dense<0.000000e+00> : vector<8x32xf32>
    %9 = tpu.matmul %7, %8, %cst {dimension_numbers = #tpu.dot_dimension_numbers<[1], [0], [0], [1], [0, 0, 1, 1], [], []>} : vector<8x32xf32>, vector<32x32xf32>, vector<8x32xf32> -> vector<8x32xf32>
    %c0_4 = arith.constant 0 : index
    %c0_5 = arith.constant 0 : index
    %10 = vector.load %arg10[%c0_4, %c0_5] : memref<8x32xf32, #tpu.memory_space<vmem>>, vector<8x32xf32>
    %c0_6 = arith.constant 0 : index
    %c0_7 = arith.constant 0 : index
    %11 = vector.load %arg11[%c0_6, %c0_7] : memref<8x32xf32, #tpu.memory_space<vmem>>, vector<8x32xf32>
    %12 = vector.extract_strided_slice %9 {offsets = [0, 0], sizes = [8, 8], strides = [1, 1]} : vector<8x32xf32> to vector<8x8xf32>
    %13 = vector.extract_strided_slice %10 {offsets = [0, 0], sizes = [8, 8], strides = [1, 1]} : vector<8x32xf32> to vector<8x8xf32>
    %14 = vector.extract_strided_slice %11 {offsets = [0, 0], sizes = [8, 8], strides = [1, 1]} : vector<8x32xf32> to vector<8x8xf32>
    %cst_8 = arith.constant dense<0.000000e+00> : vector<8x8xf32>
    %15 = tpu.matmul %12, %13, %cst_8 {dimension_numbers = #tpu.dot_dimension_numbers<[1], [1], [0], [0], [0, 0, 1, 0], [], []>} : vector<8x8xf32>, vector<8x8xf32>, vector<8x8xf32> -> vector<8x8xf32>
    %cst_9 = arith.constant dense<0xFF800000> : vector<8xf32>
    %16 = vector.multi_reduction <maximumf>, %15, %cst_9 [1] : vector<8x8xf32> to vector<8xf32>
    %17 = vector.shape_cast %16 : vector<8xf32> to vector<8x1xf32>
    %18 = vector.broadcast %17 : vector<8x1xf32> to vector<8x8xf32>
    %19 = arith.subf %15, %18 : vector<8x8xf32>
    %20 = math.exp %19 : vector<8x8xf32>
    %cst_10 = arith.constant dense<0.000000e+00> : vector<8x8xf32>
    %21 = tpu.matmul %20, %14, %cst_10 {dimension_numbers = #tpu.dot_dimension_numbers<[1], [0], [0], [1], [0, 0, 1, 1], [], []>} : vector<8x8xf32>, vector<8x8xf32>, vector<8x8xf32> -> vector<8x8xf32>
    %cst_11 = arith.constant dense<0.000000e+00> : vector<8xf32>
    %22 = vector.multi_reduction <add>, %20, %cst_11 [1] : vector<8x8xf32> to vector<8xf32>
    %23 = vector.shape_cast %22 : vector<8xf32> to vector<8x1xf32>
    %24 = tpu.reciprocal %23 : vector<8x1xf32> -> vector<8x1xf32>
    %cst_12 = arith.constant 0.353553385 : f32
    %25 = vector.broadcast %cst_12 : f32 to vector<8x1xf32>
    %26 = arith.mulf %25, %24 : vector<8x1xf32>
    %27 = vector.broadcast %26 : vector<8x1xf32> to vector<8x8xf32>
    %28 = arith.mulf %21, %27 : vector<8x8xf32>
    %29 = vector.extract_strided_slice %9 {offsets = [0, 8], sizes = [8, 8], strides = [1, 1]} : vector<8x32xf32> to vector<8x8xf32>
    %30 = vector.extract_strided_slice %10 {offsets = [0, 8], sizes = [8, 8], strides = [1, 1]} : vector<8x32xf32> to vector<8x8xf32>
    %31 = vector.extract_strided_slice %11 {offsets = [0, 8], sizes = [8, 8], strides = [1, 1]} : vector<8x32xf32> to vector<8x8xf32>
    %cst_13 = arith.constant dense<0.000000e+00> : vector<8x8xf32>
    %32 = tpu.matmul %29, %30, %cst_13 {dimension_numbers = #tpu.dot_dimension_numbers<[1], [1], [0], [0], [0, 0, 1, 0], [], []>} : vector<8x8xf32>, vector<8x8xf32>, vector<8x8xf32> -> vector<8x8xf32>
    %cst_14 = arith.constant dense<0xFF800000> : vector<8xf32>
    %33 = vector.multi_reduction <maximumf>, %32, %cst_14 [1] : vector<8x8xf32> to vector<8xf32>
    %34 = vector.shape_cast %33 : vector<8xf32> to vector<8x1xf32>
    %35 = vector.broadcast %34 : vector<8x1xf32> to vector<8x8xf32>
    %36 = arith.subf %32, %35 : vector<8x8xf32>
    %37 = math.exp %36 : vector<8x8xf32>
    %cst_15 = arith.constant dense<0.000000e+00> : vector<8x8xf32>
    %38 = tpu.matmul %37, %31, %cst_15 {dimension_numbers = #tpu.dot_dimension_numbers<[1], [0], [0], [1], [0, 0, 1, 1], [], []>} : vector<8x8xf32>, vector<8x8xf32>, vector<8x8xf32> -> vector<8x8xf32>
    %cst_16 = arith.constant dense<0.000000e+00> : vector<8xf32>
    %39 = vector.multi_reduction <add>, %37, %cst_16 [1] : vector<8x8xf32> to vector<8xf32>
    %40 = vector.shape_cast %39 : vector<8xf32> to vector<8x1xf32>
    %41 = tpu.reciprocal %40 : vector<8x1xf32> -> vector<8x1xf32>
    %cst_17 = arith.constant 0.353553385 : f32
    %42 = vector.broadcast %cst_17 : f32 to vector<8x1xf32>
    %43 = arith.mulf %42, %41 : vector<8x1xf32>
    %44 = vector.broadcast %43 : vector<8x1xf32> to vector<8x8xf32>
    %45 = arith.mulf %38, %44 : vector<8x8xf32>
    %46 = vector.extract_strided_slice %9 {offsets = [0, 16], sizes = [8, 8], strides = [1, 1]} : vector<8x32xf32> to vector<8x8xf32>
    %47 = vector.extract_strided_slice %10 {offsets = [0, 16], sizes = [8, 8], strides = [1, 1]} : vector<8x32xf32> to vector<8x8xf32>
    %48 = vector.extract_strided_slice %11 {offsets = [0, 16], sizes = [8, 8], strides = [1, 1]} : vector<8x32xf32> to vector<8x8xf32>
    %cst_18 = arith.constant dense<0.000000e+00> : vector<8x8xf32>
    %49 = tpu.matmul %46, %47, %cst_18 {dimension_numbers = #tpu.dot_dimension_numbers<[1], [1], [0], [0], [0, 0, 1, 0], [], []>} : vector<8x8xf32>, vector<8x8xf32>, vector<8x8xf32> -> vector<8x8xf32>
    %cst_19 = arith.constant dense<0xFF800000> : vector<8xf32>
    %50 = vector.multi_reduction <maximumf>, %49, %cst_19 [1] : vector<8x8xf32> to vector<8xf32>
    %51 = vector.shape_cast %50 : vector<8xf32> to vector<8x1xf32>
    %52 = vector.broadcast %51 : vector<8x1xf32> to vector<8x8xf32>
    %53 = arith.subf %49, %52 : vector<8x8xf32>
    %54 = math.exp %53 : vector<8x8xf32>
    %cst_20 = arith.constant dense<0.000000e+00> : vector<8x8xf32>
    %55 = tpu.matmul %54, %48, %cst_20 {dimension_numbers = #tpu.dot_dimension_numbers<[1], [0], [0], [1], [0, 0, 1, 1], [], []>} : vector<8x8xf32>, vector<8x8xf32>, vector<8x8xf32> -> vector<8x8xf32>
    %cst_21 = arith.constant dense<0.000000e+00> : vector<8xf32>
    %56 = vector.multi_reduction <add>, %54, %cst_21 [1] : vector<8x8xf32> to vector<8xf32>
    %57 = vector.shape_cast %56 : vector<8xf32> to vector<8x1xf32>
    %58 = tpu.reciprocal %57 : vector<8x1xf32> -> vector<8x1xf32>
    %cst_22 = arith.constant 0.353553385 : f32
    %59 = vector.broadcast %cst_22 : f32 to vector<8x1xf32>
    %60 = arith.mulf %59, %58 : vector<8x1xf32>
    %61 = vector.broadcast %60 : vector<8x1xf32> to vector<8x8xf32>
    %62 = arith.mulf %55, %61 : vector<8x8xf32>
    %63 = vector.extract_strided_slice %9 {offsets = [0, 24], sizes = [8, 8], strides = [1, 1]} : vector<8x32xf32> to vector<8x8xf32>
    %64 = vector.extract_strided_slice %10 {offsets = [0, 24], sizes = [8, 8], strides = [1, 1]} : vector<8x32xf32> to vector<8x8xf32>
    %65 = vector.extract_strided_slice %11 {offsets = [0, 24], sizes = [8, 8], strides = [1, 1]} : vector<8x32xf32> to vector<8x8xf32>
    %cst_23 = arith.constant dense<0.000000e+00> : vector<8x8xf32>
    %66 = tpu.matmul %63, %64, %cst_23 {dimension_numbers = #tpu.dot_dimension_numbers<[1], [1], [0], [0], [0, 0, 1, 0], [], []>} : vector<8x8xf32>, vector<8x8xf32>, vector<8x8xf32> -> vector<8x8xf32>
    %cst_24 = arith.constant dense<0xFF800000> : vector<8xf32>
    %67 = vector.multi_reduction <maximumf>, %66, %cst_24 [1] : vector<8x8xf32> to vector<8xf32>
    %68 = vector.shape_cast %67 : vector<8xf32> to vector<8x1xf32>
    %69 = vector.broadcast %68 : vector<8x1xf32> to vector<8x8xf32>
    %70 = arith.subf %66, %69 : vector<8x8xf32>
    %71 = math.exp %70 : vector<8x8xf32>
    %cst_25 = arith.constant dense<0.000000e+00> : vector<8x8xf32>
    %72 = tpu.matmul %71, %65, %cst_25 {dimension_numbers = #tpu.dot_dimension_numbers<[1], [0], [0], [1], [0, 0, 1, 1], [], []>} : vector<8x8xf32>, vector<8x8xf32>, vector<8x8xf32> -> vector<8x8xf32>
    %cst_26 = arith.constant dense<0.000000e+00> : vector<8xf32>
    %73 = vector.multi_reduction <add>, %71, %cst_26 [1] : vector<8x8xf32> to vector<8xf32>
    %74 = vector.shape_cast %73 : vector<8xf32> to vector<8x1xf32>
    %75 = tpu.reciprocal %74 : vector<8x1xf32> -> vector<8x1xf32>
    %cst_27 = arith.constant 0.353553385 : f32
    %76 = vector.broadcast %cst_27 : f32 to vector<8x1xf32>
    %77 = arith.mulf %76, %75 : vector<8x1xf32>
    %78 = vector.broadcast %77 : vector<8x1xf32> to vector<8x8xf32>
    %79 = arith.mulf %72, %78 : vector<8x8xf32>
    %80 = tpu.concatenate %28, %45, %62, %79 in 1 : vector<8x8xf32>, vector<8x8xf32>, vector<8x8xf32>, vector<8x8xf32> -> vector<8x32xf32>
    %cst_28 = arith.constant dense<0.000000e+00> : vector<8xf32>
    %81 = vector.multi_reduction <add>, %80, %cst_28 [1] : vector<8x32xf32> to vector<8xf32>
    %82 = vector.shape_cast %81 : vector<8xf32> to vector<8x1xf32>
    %cst_29 = arith.constant 3.200000e+01 : f32
    %83 = vector.broadcast %cst_29 : f32 to vector<8x1xf32>
    %84 = arith.divf %82, %83 : vector<8x1xf32>
    %85 = vector.broadcast %84 : vector<8x1xf32> to vector<8x32xf32>
    %86 = arith.subf %80, %85 : vector<8x32xf32>
    %87 = arith.mulf %86, %86 : vector<8x32xf32>
    %cst_30 = arith.constant dense<0.000000e+00> : vector<8xf32>
    %88 = vector.multi_reduction <add>, %87, %cst_30 [1] : vector<8x32xf32> to vector<8xf32>
    %89 = vector.shape_cast %88 : vector<8xf32> to vector<8x1xf32>
    %cst_31 = arith.constant 3.200000e+01 : f32
    %90 = vector.broadcast %cst_31 : f32 to vector<8x1xf32>
    %91 = arith.divf %89, %90 : vector<8x1xf32>
    %92 = vector.broadcast %84 : vector<8x1xf32> to vector<8x32xf32>
    %93 = arith.subf %80, %92 : vector<8x32xf32>
    %cst_32 = arith.constant 9.99999974E-6 : f32
    %94 = vector.broadcast %cst_32 : f32 to vector<8x1xf32>
    %95 = arith.addf %91, %94 : vector<8x1xf32>
    %96 = math.rsqrt %95 : vector<8x1xf32>
    %97 = vector.broadcast %96 : vector<8x1xf32> to vector<8x32xf32>
    %98 = arith.mulf %93, %97 : vector<8x32xf32>
    %c0_33 = arith.constant 0 : index
    %c0_34 = arith.constant 0 : index
    %99 = vector.load %arg7[%c0_33, %c0_34] : memref<1x32xf32, #tpu.memory_space<vmem>>, vector<1x32xf32>
    %100 = vector.shape_cast %99 : vector<1x32xf32> to vector<32xf32>
    %101 = vector.shape_cast %100 : vector<32xf32> to vector<1x32xf32>
    %102 = vector.broadcast %101 : vector<1x32xf32> to vector<8x32xf32>
    %103 = arith.mulf %98, %102 : vector<8x32xf32>
    %c0_35 = arith.constant 0 : index
    %c0_36 = arith.constant 0 : index
    %104 = vector.load %arg8[%c0_35, %c0_36] : memref<1x32xf32, #tpu.memory_space<vmem>>, vector<1x32xf32>
    %105 = vector.shape_cast %104 : vector<1x32xf32> to vector<32xf32>
    %106 = vector.shape_cast %105 : vector<32xf32> to vector<1x32xf32>
    %107 = vector.broadcast %106 : vector<1x32xf32> to vector<8x32xf32>
    %108 = arith.addf %103, %107 : vector<8x32xf32>
    %c0_37 = arith.constant 0 : index
    %c0_38 = arith.constant 0 : index
    %109 = vector.load %arg6[%c0_37, %c0_38] : memref<32x32xf32, #tpu.memory_space<vmem>>, vector<32x32xf32>
    %cst_39 = arith.constant dense<0.000000e+00> : vector<8x32xf32>
    %110 = tpu.matmul %108, %109, %cst_39 {dimension_numbers = #tpu.dot_dimension_numbers<[1], [0], [0], [1], [0, 0, 1, 1], [], []>} : vector<8x32xf32>, vector<32x32xf32>, vector<8x32xf32> -> vector<8x32xf32>
    %c0_40 = arith.constant 0 : index
    %c0_41 = arith.constant 0 : index
    %c0_42 = arith.constant 0 : index
    %111 = vector.load %arg9[%c0_40, %c0_41, %c0_42] : memref<1x8x32xf32, #tpu.memory_space<vmem>>, vector<1x8x32xf32>
    %112 = vector.shape_cast %111 : vector<1x8x32xf32> to vector<8x32xf32>
    %113 = vector.shape_cast %110 : vector<8x32xf32> to vector<1x8x32xf32>
    tpu.vector_store %arg9[%c0_40, %c0_41, %c0_42], %113 {strides = array<i32>} : memref<1x8x32xf32, #tpu.memory_space<vmem>>, vector<1x8x32xf32>,
    return
  }
  func.func @transform_0(%arg0: i32, %arg1: i32) -> (i32, i32, i32) {
    %c0_i32 = arith.constant 0 : i32
    %c0_i32_0 = arith.constant 0 : i32
    %c0_i32_1 = arith.constant 0 : i32
    return %arg0, %c0_i32, %c0_i32_0 : i32, i32, i32
  }
  func.func @transform_1(%arg0: i32, %arg1: i32) -> (i32, i32) {
    %c0_i32 = arith.constant 0 : i32
    %c0_i32_0 = arith.constant 0 : i32
    %c0_i32_1 = arith.constant 0 : i32
    return %c0_i32, %c0_i32_0 : i32, i32
  }
  func.func @transform_2(%arg0: i32, %arg1: i32) -> (i32, i32) {
    %c0_i32 = arith.constant 0 : i32
    %c0_i32_0 = arith.constant 0 : i32
    %c0_i32_1 = arith.constant 0 : i32
    return %c0_i32, %c0_i32_0 : i32, i32
  }
  func.func @transform_3(%arg0: i32, %arg1: i32) -> (i32, i32) {
    %c0_i32 = arith.constant 0 : i32
    %c0_i32_0 = arith.constant 0 : i32
    %c0_i32_1 = arith.constant 0 : i32
    return %c0_i32, %c0_i32_0 : i32, i32
  }
  func.func @transform_4(%arg0: i32, %arg1: i32) -> (i32, i32) {
    %c0_i32 = arith.constant 0 : i32
    %c0_i32_0 = arith.constant 0 : i32
    %c0_i32_1 = arith.constant 0 : i32
    return %c0_i32, %c0_i32_0 : i32, i32
  }
  func.func @transform_5(%arg0: i32, %arg1: i32) -> (i32, i32) {
    %c0_i32 = arith.constant 0 : i32
    %c0_i32_0 = arith.constant 0 : i32
    %c0_i32_1 = arith.constant 0 : i32
    return %c0_i32, %c0_i32_0 : i32, i32
  }
  func.func @transform_6(%arg0: i32, %arg1: i32) -> (i32, i32) {
    %c0_i32 = arith.constant 0 : i32
    %c0_i32_0 = arith.constant 0 : i32
    %c0_i32_1 = arith.constant 0 : i32
    return %c0_i32, %c0_i32_0 : i32, i32
  }
  func.func @transform_7(%arg0: i32, %arg1: i32) -> (i32, i32, i32) {
    %c0_i32 = arith.constant 0 : i32
    %c0_i32_0 = arith.constant 0 : i32
    return %arg0, %arg1, %c0_i32 : i32, i32, i32
  }
}

</mosaic_0001>

<bundles_post_ra>
// kernel: tpu_custom_call.1
= control target key start
LH: loop header
LB: loop body
LE: loop exit
PB: predicated region body
PF: predicated region fallthrough
CT: control target
= control target key end

     0   :  { %s1682_s0 = inlined_call_operand.hbm [shape: f32[2,8,32], index: 0, kind: input, shape index: {}]   ;;  %s1683_s1 = inlined_call_operand.hbm [shape: f32[32,32], index: 1, kind: input, shape index: {}]   ;;  %s1684_s2 = inlined_call_operand.hbm [shape: f32[32,32], index: 2, kind: input, shape index: {}]   ;;  %s1685_s3 = inlined_call_operand.hbm [shape: f32[32,32], index: 3, kind: input, shape index: {}]   ;;  %s1686_s4 = inlined_call_operand.hbm [shape: f32[32,32], index: 4, kind: input, shape index: {}]   ;;  %s1687_s5 = inlined_call_operand.vmem [shape: f32[1,32], index: 5, kind: input, shape index: {}]   ;;  %s1688_s6 = inlined_call_operand.vmem [shape: f32[1,32], index: 6, kind: input, shape index: {}]   ;;  %s1689_s7 = inlined_call_operand.hbm [shape: f32[2,8,32], index: 7, kind: output, shape index: {}]  }
   0x1   :  { %1690 = sst [smem:[#allocation18_spill]] %s1683_s1 }
   0x2   :  { %12 = vsyncpa [#allocation5], 0 }
   0x3   :  { %14 = vsyncpa [#allocation5 + $0x1], 0 }
   0x4   :  { %15 = vsyncpa [#allocation8], 0 }
   0x5   :  { %16 = vsyncpa [#allocation11], 0 }
   0x6   :  { %17 = vsyncpa [#allocation6], 0 }
   0x7   :  { %19 = vsyncpa [#allocation6 + $0x1], 0  ;;  %s1467_s24 = smov 0   ;;  %s1469_s25 = smov 0  }
   0x8   :  { %s1471_s26 = smov 0   ;;  %s1473_s27 = smov 0  }
   0x9   :  { %s1475_s28 = smov 0   ;;  %s1477_s29 = smov 0  }
   0xa LB: > { %s1001_s30 = sadd.s32 4294967295, %s1412_s29   ;;  %p1003_p0 = scmp.ge.s32.totalorder %s1412_s29, 1  ;;  %s1412_s29 = sphi %s1477_s29, %s25_s29   ;;  %s1408_s28 = sphi %s1475_s28, %s1702_s28   ;;  %s1404_s27 = sphi %s1473_s27, %s1701_s27   ;;  %s1400_s26 = sphi %s1471_s26, %s1700_s26   ;;  %s1396_s25 = sphi %s1469_s25, %s1699_s25   ;;  %s1392_s24 = sphi %s1467_s24, %s1698_s24  }
   0xb   : > { %p1501_p1 = scmp.eq.s32.totalorder %s1001_s30, 0  ;;  %p222_p2 = scmp.lt.s32.totalorder %s1412_s29, 3 }
   0xc   : > { %s1692_s1 = sld [smem:[#allocation18_spill]]  ;;  %s1414_s13 = smov [#allocation7]  }
   0xd   : > { %p1509_p3 = pnand %p1003_p0, %p222_p2  ;;  %s235_s14 = sshll.u32 %s1414_s13, 4  ;;  %s236_s14 = int_to_ptr.vmem [resolvable:$true] %s235_s14 }
   0xe   : > { %p1008_p6 = scmp.ge.s32.totalorder %s1412_s29, 2  ;;  %s261_s18 = sshll.u32 %s1685_s3, 4  ;;  %s262_s18 = int_to_ptr.hbm [resolvable:$true] %s261_s18 }
   0xf   : > { %p1058_p4 = pneg %p1509_p3  ;;  %s1415_s19 = smov 128  }
  0x10   : > { %s1416_s20 = smov 8   ;;  %s1417_s21 = smov [#allocation10]  }
  0x11   : > { %p1517_p5 = pnand %p1058_p4, %p1501_p1  ;;  %s263_s22 = sshll.u32 %s1417_s21, 4  ;;  %s264_s22 = int_to_ptr.vmem [resolvable:$true] %s263_s22 }
  0x12   : > { %s233_s11 = sshll.u32 %s1692_s1, 4  ;;  %s247_s10 = sshll.u32 %s1684_s2, 4  ;;  %s234_s11 = int_to_ptr.hbm [resolvable:$true] %s233_s11  ;;  %s248_s10 = int_to_ptr.hbm [resolvable:$true] %s247_s10 }
  0x13   : > { %1061 = dma.hbm_to_vmem [thread:$0]  (!%p1517_p5), %s234_s11, 512, %s236_s14, [#allocation8], %s1415_s19, %s1415_s19, %s1416_s20  }
  0x14   : > { %1067 = dma.hbm_to_vmem [thread:$0]  (!%p1517_p5), %s262_s18, 512, %s264_s22, [#allocation11], %s1415_s19, %s1415_s19, %s1416_s20  }
  0x15   : > { %s275_s11 = sshll.u32 %s1686_s4, 4  ;;  %s1418_s14 = smov [#allocation9]   ;;  %s276_s11 = int_to_ptr.hbm [resolvable:$true] %s275_s11 }
  0x16   : > { %s249_s17 = sshll.u32 %s1418_s14, 4  ;;  %s1419_s21 = smov [#allocation12]   ;;  %s250_s17 = int_to_ptr.vmem [resolvable:$true] %s249_s17 }
  0x17   : > { %1064 = dma.hbm_to_vmem [thread:$0]  (!%p1517_p5), %s248_s10, 512, %s250_s17, [#allocation8], %s1415_s19, %s1415_s19, %s1416_s20  }
  0x18   : > { %s277_s23 = sshll.u32 %s1419_s21, 4  ;;  %s37_s18 = sadd.s32 1, %s1408_s28  ;;  %s278_s23 = int_to_ptr.vmem [resolvable:$true] %s277_s23 }
  0x19   : > { %1070 = dma.hbm_to_vmem [thread:$0]  (!%p1517_p5), %s276_s11, 512, %s278_s23, [#allocation11], %s1415_s19, %s1415_s19, %s1416_s20  }
  0x1a   : > { %s1002_s22 = sadd.s32 4294967294, %s1412_s29   ;;  %p39_p7 = scmp.ge.s32.totalorder %s37_s18, 2 }
  0x1b   : > { %s44_s9 = sadd.s32 1, %s1400_s26  ;;  %p51_p8 = scmp.ne.s32.totalorder %s1400_s26, %s1396_s25 }
  0x1c   : > { %s1704_s18 = smov (%p39_p7, %s37_s18), 0  ;;  %p52_p9 = scmp.eq.s32.totalorder %s1412_s29, 0 }
  0x1d   : > { %p57_p10 = scmp.ne.s32.totalorder %s1396_s25, %s1392_s24  ;;  %s41_s10 = ssub.s32 %s1408_s28, %s1704_s18 }
  0x1e   : > { %p209_p11 = scmp.eq.s32.totalorder %s1001_s30, 1  ;;  %p42_p12 = scmp.eq.s32.totalorder %s41_s10, 0 }
  0x1f   : > { %p1555_p13 = por %p1501_p1, %p57_p10  ;;  %p215_p2 = scmp.eq.s32.totalorder %s1002_s22, 1 }
  0x20   : > { %p1559_p0 = por %p209_p11, %p51_p8  ;;  %p53_p4 = por %p52_p9, %p51_p8 }
  0x21   : > { %s1564_s20 = scalar_select %p42_p12, %s1400_s26, %s44_s9  }
  0x22   : > { %p1566_p5 = por %p215_p2, %p57_p10  ;;  %s297_s16 = sand.u32 1, %s1400_s26  }
  0x23   : > { %s1010_s30 = sshll.u32 %s1408_s28, 3  ;;  %p1083_p7 = scmp.lt.s32.totalorder %s1412_s29, 2 }
  0x24   : > { %s1009_s11 = sshll.u32 %s297_s16, 3  ;;  %s305_s21 = scalar_lea.hbm %s1682_s0, %s1010_s30 }
  0x25   : > { %s307_s23 = sshll.u32 %s305_s21, 4  ;;  %s301_s10 = scalar_lea.vmem [#allocation4], %s1009_s11  ;;  %s308_s23 = int_to_ptr.hbm [resolvable:$true] %s307_s23 }
  0x26   : > { %s309_s1 = sshll.u32 %s301_s10, 4  ;;  %p1072_p11 = pnand %p1083_p7, %p53_p4  ;;  %s310_s1 = int_to_ptr.vmem [resolvable:$true] %s309_s1 }
  0x27   : > { %s298_s22 = scalar_lea.sflag [#allocation5], %s297_s16  ;;  %318 = sbr.rel (%p1509_p3) target bundleno = 1236 (0x4d4), region = 48 }
  0x28   : > { %1074 = dma.hbm_to_vmem [thread:$0]  (!%p1072_p11), %s308_s23, 128, %s310_s1, %s298_s22  }
  0x29   : > { %s1579_s9 = sand.u32 (!%p1509_p3), 1, %s1396_s25  }
  0x2a   : > { %s1012_s14 = sshll.u32 (!%p1509_p3), %s1579_s9, 3  ;;  %s321_s30 = scalar_lea.sflag (!%p1509_p3), [#allocation5], %s1579_s9 }
  0x2b   : > { %s324_s11 = scalar_lea.vmem (!%p1509_p3), [#allocation4], %s1012_s14 }
  0x2c   : > { %1375 = dma.done.wait (%p1555_p13), %s321_s30, 128  }
  0x2d   : > { %1377 = vsyncadd (%p1555_p13), %s321_s30, 4294967168 }
  0x2e   : > { %1379 = dma.done.wait (%p1501_p1), [#allocation8], 1024  }
  0x2f   : > { %1381 = vsyncadd (%p1501_p1), [#allocation8], 4294966272 }
  0x30   : > { %1383 = dma.done.wait (%p1501_p1), [#allocation11], 1024  }
  0x31   : > { %1385 = vsyncadd (%p1501_p1), [#allocation11], 4294966272  ;;  %v384_v0 = vld [vmem:[#allocation9 + $0x18] sm:$0xff]  ;;  %v383_v1 = vld [vmem:[#allocation9 + $0x10] sm:$0xff]  ;;  %vm385_vm0 = vcmask 261120   ;;  %vm468_vm1 = vcmask 64512  }
  0x32   : > { %401 = vmatpush.msra.mxu0 %v384_v0  ;;  %v441_v2 = vld [vmem:[#allocation7 + $0x18] sm:$0xff]  ;;  %v382_v3 = vld [vmem:[#allocation9 + $0x8] sm:$0xff]  ;;  %v440_v4 = vld [vmem:[#allocation7 + $0x10] sm:$0xff]  ;;  %s1420_s1 = smov 104   ;;  %s1421_s8 = smov 120  }
  0x33   : > { %458 = vmatpush.msra.mxu2 %v441_v2  ;;  %v439_v5 = vld [vmem:[#allocation7 + $0x8] sm:$0xff]  ;;  %v381_v6 = vld [vmem:[#allocation9] sm:$0xff]  ;;  %v380_v7 = vld [vmem:[%s324_s11] sm:$0xff]  ;;  %s1422_s12 = smov 112   ;;  %s1423_s15 = smov 8  }
  0x34   : > { %402 = vmatpush.msra.mxu0 %v383_v1  ;;  %v438_v8 = vld [vmem:[#allocation7] sm:$0xff]  ;;  %v413_v12 = vld [vmem:[#allocation10 + $0x18] sm:$0xff]  ;;  %v412_v13 = vld [vmem:[#allocation10 + $0x10] sm:$0xff]  ;;  %s1424_s16 = smov 16   ;;  %s1425_s17 = smov 24  }
  0x35   : > { %459 = vmatpush.msra.mxu2 %v440_v4  ;;  %426 = vmatpush.msra.mxu1 %v413_v12  ;;  %v411_v14 = vld [vmem:[#allocation10 + $0x8] sm:$0xff]  ;;  %v410_v15 = vld [vmem:[#allocation10] sm:$0xff]  ;;  %s1035_s30 = sshll.u32 %s1404_s27, 3  ;;  %s1342_s22 = scalar_lea.hbm %s1689_s7, 16 }
  0x36   : > { %403 = vmatpush.msra.mxu0 %v382_v3 }
  0x37   : > { %460 = vmatpush.msra.mxu2 %v439_v5  ;;  %427 = vmatpush.msra.mxu1 %v412_v13 }
  0x38   : > { %404 = vmatpush.msra.mxu0 %v381_v6 }
  0x39   : > { %1018 = vmatmul.msk.f32.vlgmr.msra.gmra.mxu0 %vm385_vm0, %v380_v7  ;;  %461 = vmatpush.msra.mxu2 %v438_v8 }
  0x3a   : > { %1020 = vmatmul.msk.f32.vlgmr.msra.gmra.mxu2 %vm385_vm0, %v380_v7  ;;  %428 = vmatpush.msra.mxu1 %v411_v14 }
  0x3c   : > { %429 = vmatpush.msra.mxu1 %v410_v15 }
  0x3d   : > { %1019 = vmatmul.msk.f32.vlgmr.msra.gmra.mxu1 %vm385_vm0, %v380_v7 }
  0xb6   : > { %v406_v9 = vpop.f32.mrf.mxu0 }
  0xb7   : > { %409 = vst.msk [vmem:[#allocation2] sm:$0xff] %vm385_vm0, %v406_v9 }
  0xba   : > { %v431_v24 = vpop.f32.mrf.mxu1 }
  0xbb   : > { %434 = vst.msk [vmem:[#allocation3] sm:$0xff] %vm385_vm0, %v431_v24 }
  0xbd   : > { %v463_v11 = vpop.f32.mrf.mxu2 }
  0xbe   : > { %v466_v10 = vld [vmem:[#allocation2] sm:$0xff] }
  0xbf   : > { %704 = vrot.lane.b32.xlu2 %v466_v10, %s1420_s1  ;;  %545 = vrot.lane.b32.xlu1 %v466_v10, %s1421_s8 }
  0xc0   : > { %625 = vrot.lane.b32.xlu0 %v466_v10, %s1422_s12  ;;  %1021 = vmatpush.xpose.msk.msra.mxu3 %vm468_vm1, %v466_v10 }
  0xc2   : > { %v467_v25 = vld [vmem:[#allocation3] sm:$0xff] }
  0xc3   : > { %1022 = vmatmul.msk.f32.vlgmr.msra.gmra.mxu3 %vm468_vm1, %v463_v11 }
  0xc4   : > { %519 = vmatpush.msrb.mxu3 %v467_v25 }
  0xc7   : > { %702 = vrot.lane.b32.xlu2 %v463_v11, %s1420_s1  ;;  %543 = vrot.lane.b32.xlu1 %v463_v11, %s1421_s8 }
  0xc8   : > { %623 = vrot.lane.b32.xlu0 %v463_v11, %s1422_s12 }
 0x119   : > { %v705_v17 = vpop.permute.xlu2 %704 }
 0x121   : > { %v703_v21 = vpop.permute.xlu2 %702 }
 0x131   : > { %v546_v16 = vpop.permute.xlu1 %545 }
 0x132   : > { %v626_v18 = vpop.permute.xlu0 %625  ;;  %1024 = vmatpush.xpose.msk.msrb.mxu0 %vm468_vm1, %v546_v16 }
 0x133   : > { %1027 = vmatpush.xpose.msk.msrb.mxu2 %vm468_vm1, %v626_v18 }
 0x136   : > { %1030 = vmatpush.xpose.msk.msra.mxu0 %vm468_vm1, %v705_v17 }
 0x139   : > { %v544_v19 = vpop.permute.xlu1 %543 }
 0x13a   : > { %v624_v20 = vpop.permute.xlu0 %623  ;;  %1025 = vmatmul.msk.f32.vlgmr.msrb.gmra.mxu0 %vm468_vm1, %v544_v19 }
 0x13b   : > { %1028 = vmatmul.msk.f32.vlgmr.msrb.gmra.mxu2 %vm468_vm1, %v624_v20 }
 0x142   : > { %1031 = vmatmul.msk.f32.vlgmr.msra.gmra.mxu0 %vm468_vm1, %v703_v21 }
 0x146   : > { %v492_v22 = vpop.f32.mrf.mxu3 }
 0x147   : > { %v495_v23 = vsel %vm468_vm1, %v492_v22, -inf }
 0x148   : > { %496 = vmax.xlane.f32.xlu0 %v495_v23 }
 0x15c   : > { %578 = vrot.lane.b32.xlu0 %v467_v25, %s1421_s8  ;;  %s877_s8 = scalar_lea.hbm %s1689_s7, %s1035_s30 }
 0x1b7   : > { %v568_v26 = vpop.f32.mrf.mxu0 }
 0x1b8   : > { %v571_v27 = vsel %vm468_vm1, %v568_v26, -inf }
 0x1b9   : > { %572 = vmax.xlane.f32.xlu1 %v571_v27 }
 0x1bb   : > { %v497_v28 = vpop.xlane.xlu0 %496 }
 0x1bc   : > { %v498_v29 = vsub.f32 %v492_v22, %v497_v28 }
 0x1be   : > { %v499_v30 = vmul.f32 1.442695, %v498_v29  ;;  %v648_v31 = vpop.f32.mrf.mxu2 }
 0x1bf   : > { %v651_v32 = vsel %vm468_vm1, %v648_v31, -inf  ;;  %v727_v33 = vpop.f32.mrf.mxu0 }
 0x1c0   : > { %1152 = vpow2.f32 %v499_v30  ;;  %652 = vmax.xlane.f32.xlu2 %v651_v32  ;;  %v730_v35 = vsel %vm468_vm1, %v727_v33, -inf }
 0x1c6   : > { %v1153_v34 = vpop.eup %1152 }
 0x1c7   : > { %1023 = vmatmul.msk.f32.vlgmr.msrb.gmra.mxu3 %vm468_vm1, %v1153_v34  ;;  %v524_v50 = vsel %vm468_vm1, %v1153_v34, 0.0 }
 0x1c8   : > { %731 = vmax.xlane.f32.xlu2 %v730_v35 }
 0x1ce   : > { %v579_v36 = vpop.permute.xlu0 %578 }
 0x1cf   : > { %599 = vmatpush.msrb.mxu1 %v579_v36 }
 0x1d2   : > { %657 = vrot.lane.b32.xlu1 %v467_v25, %s1422_s12  ;;  %s375_s12 = scalar_lea.vmem [#allocation13], %s1012_s14 }
 0x1e0   : > { %736 = vrot.lane.b32.xlu2 %v467_v25, %s1420_s1 }
 0x22c   : > { %v573_v37 = vpop.xlane.xlu1 %572 }
 0x22d   : > { %v574_v38 = vsub.f32 %v568_v26, %v573_v37 }
 0x22f   : > { %v575_v39 = vmul.f32 1.442695, %v574_v38 }
 0x231   : > { %1154 = vpow2.f32 %v575_v39 }
 0x233   : > { %v653_v40 = vpop.xlane.xlu2 %652 }
 0x234   : > { %v654_v41 = vsub.f32 %v648_v31, %v653_v40 }
 0x236   : > { %v655_v42 = vmul.f32 1.442695, %v654_v41 }
 0x237   : > { %v1155_v43 = vpop.eup %1154 }
 0x238   : > { %1156 = vpow2.f32 %v655_v42  ;;  %1026 = vmatmul.msk.f32.vlgmr.msrb.gmra.mxu1 %vm468_vm1, %v1155_v43  ;;  %v604_v44 = vsel %vm468_vm1, %v1155_v43, 0.0 }
 0x239   : > { %605 = vadd.xlane.f32.xlu0 %v604_v44 }
 0x23b   : > { %v732_v45 = vpop.xlane.xlu2 %731 }
 0x23c   : > { %v733_v46 = vsub.f32 %v727_v33, %v732_v45 }
 0x23e   : > { %v1157_v47 = vpop.eup %1156  ;;  %v734_v48 = vmul.f32 1.442695, %v733_v46 }
 0x23f   : > { %v683_v49 = vsel %vm468_vm1, %v1157_v47, 0.0 }
 0x240   : > { %1158 = vpow2.f32 %v734_v48  ;;  %684 = vadd.xlane.f32.xlu1 %v683_v49 }
 0x241   : > { %525 = vadd.xlane.f32.xlu0 %v524_v50 }
 0x243   : > { %v737_v51 = vpop.permute.xlu2 %736 }
 0x244   : > { %757 = vmatpush.msra.mxu1 %v737_v51  ;;  %v658_v52 = vpop.permute.xlu1 %657 }
 0x245   : > { %678 = vmatpush.msra.mxu3 %v658_v52 }
 0x246   : > { %v1159_v53 = vpop.eup %1158  ;;  %1029 = vmatmul.msk.f32.vlgmr.msra.gmra.mxu3 %vm468_vm1, %v1157_v47 }
 0x247   : > { %1032 = vmatmul.msk.f32.vlgmr.msra.gmra.mxu1 %vm468_vm1, %v1159_v53  ;;  %v762_v54 = vsel %vm468_vm1, %v1159_v53, 0.0 }
 0x248   : > { %763 = vadd.xlane.f32.xlu2 %v762_v54  ;;  %v1426_v54 = vmov 32.0  }
 0x24a   : > { %v521_v13 = vpop.f32.mrf.mxu3 }
 0x2ac   : > { %v606_v55 = vpop.xlane.xlu0 %605 }
 0x2ad   : > { %1160 = vrcp.f32 %v606_v55  ;;  %v618_v60 = vand.u32 2147483648, %v606_v55  ;;  %v616_v62 = vand.u32 2147483647, %v606_v55  ;;  %vm612_vm3 = vweird.f32 %v606_v55 }
 0x2af   : > { %v619_v2 = vor.u32 1.1754944e-38, %v618_v60  ;;  %vm617_vm5 = vcmp.eq.f32.partialorder %v616_v62, 8.507059e+37 }
 0x2b3   : > { %v1161_v56 = vpop.eup %1160  ;;  %v685_v57 = vpop.xlane.xlu1 %684 }
 0x2b4   : > { %v608_v58 = vmul.f32 %v1161_v56, %v606_v55  ;;  %1162 = vrcp.f32 %v685_v57  ;;  %vm613_vm2 = vweird.f32 %v1161_v56  ;;  %v697_v10 = vand.u32 2147483648, %v685_v57  ;;  %v526_v34 = vpop.xlane.xlu0 %525 }
 0x2b5   : > { %vm614_vm4 = vmor %vm612_vm3, %vm613_vm2  ;;  %v601_v9 = vpop.f32.mrf.mxu1  ;;  %v695_v12 = vand.u32 2147483647, %v685_v57  ;;  %vm691_vm7 = vweird.f32 %v685_v57  ;;  %v538_v40 = vand.u32 2147483648, %v526_v34  ;;  %vm532_vm15 = vweird.f32 %v526_v34 }
 0x2b6   : > { %v609_v59 = vsub.f32 1.0, %v608_v58  ;;  %v698_v18 = vor.u32 1.1754944e-38, %v697_v10  ;;  %v536_v41 = vand.u32 2147483647, %v526_v34 }
 0x2b7   : > { %vm696_vm9 = vcmp.eq.f32.partialorder %v695_v12, 8.507059e+37  ;;  %v539_v43 = vor.u32 1.1754944e-38, %v538_v40 }
 0x2b8   : > { %v610_v61 = vmul.f32 %v1161_v56, %v609_v59  ;;  %vm537_vm3 = vcmp.eq.f32.partialorder %v536_v41, 8.507059e+37 }
 0x2ba   : > { %v1163_v63 = vpop.eup %1162  ;;  %v611_v0 = vadd.f32 %v1161_v56, %v610_v61 }
 0x2bb   : > { %v687_v1 = vmul.f32 %v1163_v63, %v685_v57  ;;  %v764_v3 = vpop.xlane.xlu2 %763  ;;  %vm692_vm6 = vweird.f32 %v1163_v63 }
 0x2bc   : > { %v615_v4 = vsel %vm614_vm4, %v1161_v56, %v611_v0  ;;  %1164 = vrcp.f32 %v764_v3  ;;  %vm693_vm8 = vmor %vm691_vm7, %vm692_vm6  ;;  %v776_v21 = vand.u32 2147483648, %v764_v3  ;;  %v774_v23 = vand.u32 2147483647, %v764_v3 }
 0x2bd   : > { %v688_v5 = vsub.f32 1.0, %v687_v1  ;;  %v620_v6 = vsel %vm617_vm5, %v619_v2, %v615_v4  ;;  %vm770_vm11 = vweird.f32 %v764_v3  ;;  %1166 = vrcp.f32 %v526_v34  ;;  %v840_v2 = vld [vmem:[#allocation12 + $0x18] sm:$0xff]  ;;  %v838_v4 = vld [vmem:[#allocation12 + $0x8] sm:$0xff] }
 0x2be   : > { %v621_v7 = vmul.f32 0.35355338, %v620_v6  ;;  %v777_v27 = vor.u32 1.1754944e-38, %v776_v21  ;;  %vm775_vm13 = vcmp.eq.f32.partialorder %v774_v23, 8.507059e+37  ;;  %vm794_vm4 = vcmask 130048   ;;  %856 = vmatpush.msra.mxu2 %v840_v2 }
 0x2bf   : > { %v689_v8 = vmul.f32 %v1163_v63, %v688_v5  ;;  %vm796_vm5 = vcmask 195584   ;;  %1168 = vrcp.f32 %v1426_v54  ;;  %v837_v5 = vld [vmem:[#allocation12] sm:$0xff] }
 0x2c0   : > { %v622_v11 = vmul.f32 %v621_v7, %v601_v9 }
 0x2c1   : > { %v690_v14 = vadd.f32 %v1163_v63, %v689_v8 }
 0x2c2   : > { %v1165_v15 = vpop.eup %1164  ;;  %782 = vrot.lane.b32.xlu1 %v622_v11, %s1423_s15  ;;  %s879_s15 = sshll.u32 %s375_s12, 4  ;;  %s880_s15 = int_to_ptr.vmem [resolvable:$true] %s879_s15 }
 0x2c3   : > { %v766_v16 = vmul.f32 %v1165_v15, %v764_v3  ;;  %v694_v17 = vsel %vm693_vm8, %v1163_v63, %v690_v14  ;;  %vm771_vm10 = vweird.f32 %v1165_v15  ;;  %v1167_v35 = vpop.eup %1166  ;;  %v839_v3 = vld [vmem:[#allocation12 + $0x10] sm:$0xff] }
 0x2c4   : > { %v699_v20 = vsel %vm696_vm9, %v698_v18, %v694_v17  ;;  %vm772_vm12 = vmor %vm770_vm11, %vm771_vm10  ;;  %v759_v32 = vpop.f32.mrf.mxu1  ;;  %v528_v36 = vmul.f32 %v1167_v35, %v526_v34  ;;  %vm533_vm14 = vweird.f32 %v1167_v35  ;;  %857 = vmatpush.msra.mxu2 %v839_v3  ;;  %v1151_v18 = vld [vmem:[%s1688_s6] ss:$0 sm:$0xff] }
 0x2c5   : > { %v767_v19 = vsub.f32 1.0, %v766_v16  ;;  %v700_v24 = vmul.f32 0.35355338, %v699_v20  ;;  %vm534_vm2 = vmor %vm532_vm15, %vm533_vm14  ;;  %v1169_v55 = vpop.eup %1168 }
 0x2c6   : > { %v529_v37 = vsub.f32 1.0, %v528_v36  ;;  %v802_v56 = vmul.f32 32.0, %v1169_v55  ;;  %vm806_vm6 = vweird.f32 %v1169_v55  ;;  %858 = vmatpush.msra.mxu2 %v838_v4 }
 0x2c7   : > { %v768_v22 = vmul.f32 %v1165_v15, %v767_v19 }
 0x2c8   : > { %v530_v38 = vmul.f32 %v1167_v35, %v529_v37  ;;  %v803_v57 = vsub.f32 1.0, %v802_v56  ;;  %859 = vmatpush.msra.mxu2 %v837_v5 }
 0x2c9   : > { %v769_v25 = vadd.f32 %v1165_v15, %v768_v22  ;;  %v680_v26 = vpop.f32.mrf.mxu3 }
 0x2ca   : > { %v701_v28 = vmul.f32 %v700_v24, %v680_v26  ;;  %v531_v39 = vadd.f32 %v1167_v35, %v530_v38  ;;  %v804_v58 = vmul.f32 %v1169_v55, %v803_v57 }
 0x2cb   : > { %v773_v29 = vsel %vm772_vm12, %v1165_v15, %v769_v25  ;;  %v1150_v15 = vld [vmem:[%s1687_s5] ss:$0 sm:$0xff] }
 0x2cc   : > { %v778_v30 = vsel %vm775_vm13, %v777_v27, %v773_v29  ;;  %786 = vrot.lane.b32.xlu0 %v701_v28, %s1424_s16  ;;  %v535_v42 = vsel %vm534_vm2, %v1167_v35, %v531_v39  ;;  %v805_v59 = vadd.f32 %v1169_v55, %v804_v58  ;;  %s881_s16 = sshll.u32 %s877_s8, 4  ;;  %s882_s16 = int_to_ptr.hbm [resolvable:$true] %s881_s16 }
 0x2cd   : > { %v779_v31 = vmul.f32 0.35355338, %v778_v30  ;;  %v540_v44 = vsel %vm537_vm3, %v539_v43, %v535_v42  ;;  %s1336_s21 = sshra.s32 %s882_s16, 4  ;;  %s1337_s21 = int_to_ptr.hbm [resolvable:$true] %s1336_s21 }
 0x2ce   : > { %v541_v45 = vmul.f32 0.35355338, %v540_v44  ;;  %v807_v60 = vsel %vm806_vm6, %v1169_v55, %v805_v59  ;;  %s1338_s23 = scalar_lea.hbm %s1337_s21, 8  ;;  %p1343_p9 = scmp.lt.s32.totalorder %s1337_s21, %s1689_s7 }
 0x2cf   : > { %v780_v33 = vmul.f32 %v779_v31, %v759_v32  ;;  %p1339_p1 = scmp.ne.s32.totalorder %s1337_s21, %s1338_s23  ;;  %p1344_p10 = scmp.lt.s32.totalorder %s1342_s22, %s1338_s23 }
 0x2d0   : > { %v542_v47 = vmul.f32 %v541_v45, %v521_v13 }
 0x2d1   : > { %790 = vrot.lane.b32.xlu2 %v780_v33, %s1425_s17  ;;  %s866_s17 = scalar_lea.sflag [#allocation6], %s1579_s9  ;;  %p1340_p3 = pnand %p1339_p1, %p1559_p0 }
 0x2d2   : > { %p1345_p12 = por %p1344_p10, %p1343_p9 }
 0x2d3   : > { %p1341_p8 = pneg %p1340_p3 }
 0x2d5   : > { %p1346_p13 = pnand %p1345_p12, %p1341_p8 }
 0x32b   : > { %v791_v50 = vpop.permute.xlu2 %790 }
 0x334   : > { %v783_v46 = vpop.permute.xlu1 %782 }
 0x335   : > { %v793_v48 = vsel %vm468_vm1, %v542_v47, %v783_v46 }
 0x33e   : > { %v787_v49 = vpop.permute.xlu0 %786 }
 0x33f   : > { %v795_v51 = vsel %vm794_vm4, %v793_v48, %v787_v49 }
 0x340   : > { %v797_v52 = vsel %vm796_vm5, %v795_v51, %v791_v50 }
 0x341   : > { %v798_v53 = vsel %vm385_vm0, %v797_v52, 0.0 }
 0x342   : > { %799 = vadd.xlane.f32.xlu0 %v798_v53 }
 0x3b5   : > { %v800_v61 = vpop.xlane.xlu0 %799 }
 0x3b6   : > { %v808_v62 = vmul.f32 %v807_v60, %v800_v61 }
 0x3b8   : > { %v809_v63 = vsub.f32 %v797_v52, %v808_v62 }
 0x3ba   : > { %v810_v0 = vmul.f32 %v809_v63, %v809_v63 }
 0x3bc   : > { %v811_v1 = vsel %vm385_vm0, %v810_v0, 0.0 }
 0x3bd   : > { %812 = vadd.xlane.f32.xlu1 %v811_v1 }
 0x430   : > { %v813_v6 = vpop.xlane.xlu1 %812 }
 0x431   : > { %v814_v7 = vmul.f32 %v813_v6, %v807_v60 }
 0x433   : > { %v815_v8 = vadd.f32 1e-05, %v814_v7 }
 0x435   : > { %1170 = vrsqrt.f32 %v815_v8  ;;  %vm822_vm7 = vweird.f32 %v815_v8 }
 0x43b   : > { %v1171_v9 = vpop.eup %1170 }
 0x43c   : > { %v817_v10 = vmul.f32 %v1171_v9, %v815_v8  ;;  %vm823_vm1 = vweird.f32 %v1171_v9 }
 0x43d   : > { %vm824_vm8 = vmor %vm822_vm7, %vm823_vm1 }
 0x43e   : > { %v818_v11 = vmul.f32 %v1171_v9, %v817_v10 }
 0x440   : > { %v819_v12 = vmul.f32 0.5, %v818_v11 }
 0x442   : > { %v820_v13 = vsub.f32 1.5, %v819_v12 }
 0x444   : > { %v821_v14 = vmul.f32 %v1171_v9, %v820_v13 }
 0x446   : > { %v825_v16 = vsel %vm824_vm8, %v1171_v9, %v821_v14 }
 0x447   : > { %v826_v17 = vmul.f32 %v825_v16, %v809_v63 }
 0x449   : > { %v831_v19 = vmul.f32 %v1150_v15, %v826_v17 }
 0x44b   : > { %v836_v20 = vadd.f32 %v1151_v18, %v831_v19 }
 0x44d   : > { %1033 = vmatmul.msk.f32.vlgmr.msra.gmra.mxu2 %vm385_vm0, %v836_v20 }
 0x4d0   : > { %v861_v21 = vpop.f32.mrf.mxu2 }
 0x4d1   : > { %864 = vst.msk [vmem:[%s375_s12] sm:$0xff] %vm385_vm0, %v861_v21 }
 0x4d2   : > { %1349 = shalt.err (!%p1346_p13)
}
 0x4d3   : > { %1056 = dma.vmem_to_hbm [thread:$0]  (%p1559_p0), %s880_s15, 128, %s882_s16, %s866_s17  }
 0x4d4 PF: > { %s893_s9 = sand.u32 1, %s1392_s24   ;;  %p1076_p2 = pnand %p1008_p6, %p1566_p5 }
 0x4d5   : > { %s894_s11 = scalar_lea.sflag [#allocation6], %s893_s9 }
 0x4d6   : > { %p1077_p4 = pneg %p1076_p2 }
 0x4d8   : > { %1387 = dma.done.wait (%p1077_p4), %s894_s11, 128  }
 0x4d9   : > { %1389 = vsyncadd (%p1077_p4), %s894_s11, 4294967168  ;;  %s25_s29 = sadd.s32 1, %s1412_s29   ;;  %s1698_s24 = smov %s1396_s25 }
 0x4da   : > { %p22_p7 = scmp.ge.s32.totalorder %s25_s29, 4   ;;  %s1699_s25 = smov %s1400_s26 }
 0x4db   : > { %s1700_s26 = smov %s1564_s20  ;;  %s1701_s27 = smov %s1408_s28 }
 0x4dc   : > { %s1702_s28 = smov %s1704_s18  ;;  %24 = sbr.rel (!%p22_p7) target bundleno = 10 (0xa), region = 114 }
 0x4e1   :  { %900 = vsyncpa [#allocation5], 1 }
 0x4e2   :  { %902 = vsyncpa [#allocation5 + $0x1], 1 }
 0x4e3   :  { %903 = vsyncpa [#allocation8], 1 }
 0x4e4   :  { %904 = vsyncpa [#allocation11], 1 }
 0x4e5   :  { %905 = vsyncpa [#allocation6], 1 }
 0x4e6   :  { %907 = vsyncpa [#allocation6 + $0x1], 1 }

</bundles_post_ra>
